<compile_context>
chip_gen: v7x
topology: tpu7x:2x2x1
jax: 0.10.0
libtpu: 0.0.40
codegen_flags: <defaults>
</compile_context>

<pallas_src>
import jax
import jax.numpy as jnp
from jax import lax
from jax.experimental import pallas as pl
from jax.experimental.pallas import tpu as pltpu


def _spatial_tile(hw: int) -> int:
    """Largest lane-aligned tile that evenly divides HW (else full extent)."""
    for t in (2048, 1024, 512, 256, 128):
        if hw % t == 0:
            return t
    return hw  # full-extent block is always a legal block shape


def cam_attention_kernel(x_ref, att_ref, energy_acc):
    """Accumulate the C x C channel Gram matrix over spatial tiles; finalize
    CAM's (rowmax - energy) softmax on the last tile."""
    t = pl.program_id(1)

    @pl.when(t == 0)
    def _init():
        energy_acc[...] = jnp.zeros_like(energy_acc)

    xt = x_ref[0]                                            # (C, THW)
    # energy += x_tile @ x_tile^T : contract the spatial axis of both operands
    # directly (no explicit transpose); accumulate in f32.
    energy_acc[...] += lax.dot_general(
        xt, xt,
        dimension_numbers=(((1,), (1,)), ((), ())),
        preferred_element_type=jnp.float32)

    @pl.when(t == pl.num_programs(1) - 1)
    def _finalize():
        energy = energy_acc[...]                             # (C, C) f32
        row_max = jnp.max(energy, axis=-1, keepdims=True)
        e = row_max - energy                                 # CAM max-trick
        m = jnp.max(e, axis=-1, keepdims=True)               # stable softmax
        p = jnp.exp(e - m)
        denom = jnp.sum(p, axis=-1, keepdims=True)
        att = p * pl.reciprocal(denom, approx=False)
        att_ref[0] = att.astype(att_ref.dtype)


def cam_apply_kernel(gamma_ref, att_ref, x_ref, o_ref):
    """out_tile = gamma * (att @ x_tile) + x_tile, lane-dense over HW."""
    xt = x_ref[0]                                            # (C, THW)
    att = att_ref[0].astype(xt.dtype)                        # (C, C)
    out = lax.dot_general(
        att, xt,
        dimension_numbers=(((1,), (0,)), ((), ())),
        preferred_element_type=jnp.float32)                  # (C, THW) f32
    gamma = gamma_ref[0]                                     # scalar from SMEM
    o_ref[0] = (gamma * out + xt.astype(jnp.float32)).astype(o_ref.dtype)


def cam_forward(x_nchw, gamma):
    """x_nchw: (B, C, H, W); gamma: (1,) f32.  Returns (B, C, H, W)."""
    B, C, H, W = x_nchw.shape
    HW = H * W
    x_flat = x_nchw.reshape(B, C, HW)        # free reshape — no HBM transpose

    thw = _spatial_tile(HW)
    n_t = HW // thw

    # Pass 1: per-batch channel attention matrix (B, C, C), f32.
    att = pl.pallas_call(
        cam_attention_kernel,
        out_shape=jax.ShapeDtypeStruct((B, C, C), jnp.float32),
        grid=(B, n_t),
        in_specs=[pl.BlockSpec((1, C, thw), lambda b, t: (b, 0, t))],
        out_specs=pl.BlockSpec((1, C, C), lambda b, t: (b, 0, 0)),
        scratch_shapes=[pltpu.VMEM((C, C), jnp.float32)],
        compiler_params=pltpu.CompilerParams(
            dimension_semantics=("parallel", "arbitrary")),
    )(x_flat)

    # Pass 2: apply attention + residual; both grid axes independent.
    out_flat = pl.pallas_call(
        cam_apply_kernel,
        out_shape=jax.ShapeDtypeStruct((B, C, HW), x_nchw.dtype),
        grid=(B, n_t),
        in_specs=[
            pl.BlockSpec(memory_space=pltpu.MemorySpace.SMEM),   # gamma
            pl.BlockSpec((1, C, C), lambda b, t: (b, 0, 0)),     # att
            pl.BlockSpec((1, C, thw), lambda b, t: (b, 0, t)),   # x tile
        ],
        out_specs=pl.BlockSpec((1, C, thw), lambda b, t: (b, 0, t)),
        compiler_params=pltpu.CompilerParams(
            dimension_semantics=("parallel", "parallel")),
    )(gamma, att, x_flat)

    return out_flat.reshape(B, C, H, W)


def cam_reference(x_nchw, gamma):
    """Pure-JAX reference mirroring the PyTorch CAM forward exactly."""
    B, C, H, W = x_nchw.shape
    xf = x_nchw.reshape(B, C, H * W)                         # (B, C, HW)
    energy = jnp.einsum('bik,bjk->bij', xf, xf,
                        precision=lax.Precision.HIGHEST)     # (B, C, C)
    energy = jnp.max(energy, axis=-1, keepdims=True) - energy
    att = jax.nn.softmax(energy, axis=-1)
    out = jnp.einsum('bij,bjk->bik', att, xf,
                     precision=lax.Precision.HIGHEST)        # (B, C, HW)
    return gamma[0] * out.reshape(B, C, H, W) + x_nchw


if __name__ == "__main__":
    key = jax.random.PRNGKey(0)
    B, C, H, W = 2, 32, 16, 16                               # HW = 256 (lane-dense)

    x = jax.random.normal(key, (B, C, H, W), dtype=jnp.float32)
    # Module __init__ sets gamma = 0 (output would equal x); use a nonzero
    # deterministic value so the attention path is actually exercised.
    gamma = jnp.full((1,), 0.5, dtype=jnp.float32)

    y = cam_forward(x, gamma)
    y = jax.block_until_ready(y)

    y_ref = cam_reference(x, gamma)
    assert y.shape == (B, C, H, W)
    assert jnp.allclose(y, y_ref, atol=1e-3, rtol=1e-3), "mismatch vs reference"

    print("KERNEL_OK")
</pallas_src>

<mosaic_0001>
module attributes {stable_mosaic.version = 11 : i64} {
  func.func @cam_attention_kernel(%arg0: i32, %arg1: i32, %arg2: memref<1x32x256xf32, #tpu.memory_space<vmem>>, %arg3: memref<1x32x32xf32, #tpu.memory_space<vmem>>, %arg4: memref<32x32xf32, #tpu.memory_space<vmem>>) attributes {dimension_semantics = [#tpu.dimension_semantics<parallel>, #tpu.dimension_semantics<arbitrary>], iteration_bounds = array<i64: 2, 1>, scalar_prefetch = 0 : i64, scratch_operands = 1 : i64, tpu.core_type = #tpu.core_type<tc>, window_params = [{transform_indices = @transform_0, window_bounds = array<i64: 1, 32, 256>}, {transform_indices = @transform_1, window_bounds = array<i64: 1, 32, 32>}]} {
    %c0_i32 = arith.constant 0 : i32
    %0 = arith.cmpi eq, %arg1, %c0_i32 : i32
    %1 = arith.extui %0 : i1 to i32
    %c0_i32_0 = arith.constant 0 : i32
    %2 = arith.cmpi ne, %1, %c0_i32_0 : i32
    scf.if %2 {
      %cst_9 = arith.constant 0.000000e+00 : f32
      %12 = vector.broadcast %cst_9 : f32 to vector<32x32xf32>
      %c0_10 = arith.constant 0 : index
      %c0_11 = arith.constant 0 : index
      %13 = vector.load %arg4[%c0_10, %c0_11] : memref<32x32xf32, #tpu.memory_space<vmem>>, vector<32x32xf32>
      tpu.vector_store %arg4[%c0_10, %c0_11], %12 {strides = array<i32>} : memref<32x32xf32, #tpu.memory_space<vmem>>, vector<32x32xf32>,
    } else {
    }
    %c0 = arith.constant 0 : index
    %c0_1 = arith.constant 0 : index
    %c0_2 = arith.constant 0 : index
    %3 = vector.load %arg2[%c0, %c0_1, %c0_2] : memref<1x32x256xf32, #tpu.memory_space<vmem>>, vector<1x32x256xf32>
    %4 = vector.shape_cast %3 : vector<1x32x256xf32> to vector<32x256xf32>
    %c0_3 = arith.constant 0 : index
    %c0_4 = arith.constant 0 : index
    %5 = vector.load %arg4[%c0_3, %c0_4] : memref<32x32xf32, #tpu.memory_space<vmem>>, vector<32x32xf32>
    %cst = arith.constant dense<0.000000e+00> : vector<32x32xf32>
    %6 = tpu.matmul %4, %4, %cst {dimension_numbers = #tpu.dot_dimension_numbers<[1], [1], [0], [0], [0, 0, 1, 0], [], []>} : vector<32x256xf32>, vector<32x256xf32>, vector<32x32xf32> -> vector<32x32xf32>
    %7 = arith.addf %5, %6 : vector<32x32xf32>
    %c0_5 = arith.constant 0 : index
    %c0_6 = arith.constant 0 : index
    %8 = vector.load %arg4[%c0_5, %c0_6] : memref<32x32xf32, #tpu.memory_space<vmem>>, vector<32x32xf32>
    tpu.vector_store %arg4[%c0_5, %c0_6], %7 {strides = array<i32>} : memref<32x32xf32, #tpu.memory_space<vmem>>, vector<32x32xf32>,
    %c0_i32_7 = arith.constant 0 : i32
    %9 = arith.cmpi eq, %arg1, %c0_i32_7 : i32
    %10 = arith.extui %9 : i1 to i32
    %c0_i32_8 = arith.constant 0 : i32
    %11 = arith.cmpi ne, %10, %c0_i32_8 : i32
    scf.if %11 {
      %c0_9 = arith.constant 0 : index
      %c0_10 = arith.constant 0 : index
      %12 = vector.load %arg4[%c0_9, %c0_10] : memref<32x32xf32, #tpu.memory_space<vmem>>, vector<32x32xf32>
      %cst_11 = arith.constant dense<0xFF800000> : vector<32xf32>
      %13 = vector.multi_reduction <maximumf>, %12, %cst_11 [1] : vector<32x32xf32> to vector<32xf32>
      %14 = vector.shape_cast %13 : vector<32xf32> to vector<32x1xf32>
      %15 = vector.broadcast %14 : vector<32x1xf32> to vector<32x32xf32>
      %16 = arith.subf %15, %12 : vector<32x32xf32>
      %cst_12 = arith.constant dense<0xFF800000> : vector<32xf32>
      %17 = vector.multi_reduction <maximumf>, %16, %cst_12 [1] : vector<32x32xf32> to vector<32xf32>
      %18 = vector.shape_cast %17 : vector<32xf32> to vector<32x1xf32>
      %19 = vector.broadcast %18 : vector<32x1xf32> to vector<32x32xf32>
      %20 = arith.subf %16, %19 : vector<32x32xf32>
      %21 = math.exp %20 : vector<32x32xf32>
      %cst_13 = arith.constant dense<0.000000e+00> : vector<32xf32>
      %22 = vector.multi_reduction <add>, %21, %cst_13 [1] : vector<32x32xf32> to vector<32xf32>
      %23 = vector.shape_cast %22 : vector<32xf32> to vector<32x1xf32>
      %24 = tpu.reciprocal %23 : vector<32x1xf32> -> vector<32x1xf32>
      %25 = vector.broadcast %24 : vector<32x1xf32> to vector<32x32xf32>
      %26 = arith.mulf %21, %25 : vector<32x32xf32>
      %c0_14 = arith.constant 0 : index
      %c0_15 = arith.constant 0 : index
      %c0_16 = arith.constant 0 : index
      %27 = vector.load %arg3[%c0_14, %c0_15, %c0_16] : memref<1x32x32xf32, #tpu.memory_space<vmem>>, vector<1x32x32xf32>
      %28 = vector.shape_cast %27 : vector<1x32x32xf32> to vector<32x32xf32>
      %29 = vector.shape_cast %26 : vector<32x32xf32> to vector<1x32x32xf32>
      tpu.vector_store %arg3[%c0_14, %c0_15, %c0_16], %29 {strides = array<i32>} : memref<1x32x32xf32, #tpu.memory_space<vmem>>, vector<1x32x32xf32>,
    } else {
    }
    return
  }
  func.func @transform_0(%arg0: i32, %arg1: i32) -> (i32, i32, i32) {
    %c0_i32 = arith.constant 0 : i32
    %c0_i32_0 = arith.constant 0 : i32
    return %arg0, %c0_i32, %arg1 : i32, i32, i32
  }
  func.func @transform_1(%arg0: i32, %arg1: i32) -> (i32, i32, i32) {
    %c0_i32 = arith.constant 0 : i32
    %c0_i32_0 = arith.constant 0 : i32
    %c0_i32_1 = arith.constant 0 : i32
    return %arg0, %c0_i32, %c0_i32_0 : i32, i32, i32
  }
}

</mosaic_0001>

<bundles_post_ra>
// kernel: tpu_custom_call.1
= control target key start
LH: loop header
LB: loop body
LE: loop exit
PB: predicated region body
PF: predicated region fallthrough
CT: control target
= control target key end

     0   :  { %6 = vsyncpa [#allocation4], 0  ;;  %s879_s0 = inlined_call_operand.hbm [shape: f32[2,32,256], index: 0, kind: input, shape index: {}]   ;;  %s880_s1 = inlined_call_operand.hbm [shape: f32[2,32,32], index: 1, kind: output, shape index: {}]  }
   0x1   :  { %8 = vsyncpa [#allocation4 + $0x1], 0 }
   0x2   :  { %9 = vsyncpa [#allocation5], 0 }
   0x3   :  { %11 = vsyncpa [#allocation5 + $0x1], 0  ;;  %s679_s6 = smov 0   ;;  %s681_s7 = smov 0  }
   0x4   :  { %s683_s8 = smov 0   ;;  %s685_s9 = smov 0  }
   0x5   :  { %s687_s10 = smov 0   ;;  %s689_s11 = smov 0  }
   0x6 LB: > { %s436_s12 = sadd.s32 4294967295, %s660_s11   ;;  %s437_s13 = sadd.s32 4294967294, %s660_s11   ;;  %s660_s11 = sphi %s689_s11, %s17_s11   ;;  %s656_s10 = sphi %s687_s10, %s895_s10   ;;  %s652_s9 = sphi %s685_s9, %s894_s9   ;;  %s648_s8 = sphi %s683_s8, %s893_s8   ;;  %s644_s7 = sphi %s681_s7, %s892_s7   ;;  %s640_s6 = sphi %s679_s6, %s891_s6  }
   0x7   : > { %s29_s14 = sadd.s32 1, %s656_s10  ;;  %s38_s15 = sadd.s32 1, %s648_s8 }
   0x8   : > { %p31_p0 = scmp.ge.s32.totalorder %s29_s14, 2  ;;  %p45_p1 = scmp.ne.s32.totalorder %s648_s8, %s644_s7 }
   0x9   : > { %p46_p2 = scmp.eq.s32.totalorder %s660_s11, 0  ;;  %p51_p3 = scmp.ne.s32.totalorder %s644_s7, %s640_s6 }
   0xa   : > { %s897_s14 = smov (%p31_p0, %s29_s14), 0  ;;  %p52_p5 = scmp.eq.s32.totalorder %s436_s12, 0 }
   0xb   : > { %p720_p4 = por %p46_p2, %p45_p1  ;;  %s33_s17 = ssub.s32 %s656_s10, %s897_s14 }
   0xc   : > { %p75_p6 = scmp.eq.s32.totalorder %s436_s12, 1  ;;  %p36_p7 = scmp.eq.s32.totalorder %s33_s17, 0 }
   0xd   : > { %p726_p8 = por %p52_p5, %p51_p3  ;;  %p81_p10 = scmp.eq.s32.totalorder %s437_s13, 1 }
   0xe   : > { %p730_p9 = por %p75_p6, %p45_p1  ;;  %p477_p13 = scmp.lt.s32.totalorder %s660_s11, 2 }
   0xf   : > { %s735_s20 = scalar_select %p36_p7, %s648_s8, %s38_s15  }
  0x10   : > { %s884_s19 = scalar_select %p730_p9, 1, 0 }
  0x11   : > { %p737_p11 = por %p81_p10, %p51_p3  ;;  %s101_s22 = sand.u32 1, %s648_s8  }
  0x12   : > { %s440_s23 = sshll.u32 %s101_s22, 6  ;;  %s451_s24 = sshll.u32 %s656_s10, 10 }
  0x13   : > { %s885_s21 = scalar_select %p737_p11, 1, 0 }
  0x14   : > { %s748_s27 = scalar_lea.hbm %s879_s0, %s451_s24  ;;  %s105_s28 = scalar_lea.vmem [#allocation3], %s440_s23 }
  0x15   : > { %s114_s29 = sshll.u32 %s105_s28, 4  ;;  %p754_p0 = pnand %p477_p13, %p720_p4  ;;  %s750_s29 = int_to_ptr.vmem [resolvable:$true] %s114_s29 }
  0x16   : > { %s759_s2 = scalar_lea.sflag [#allocation4], %s101_s22  ;;  %s548_s3 = scalar_lea.hbm %s748_s27, 1024 }
  0x17   : > { %p549_p2 = scmp.ne.s32.totalorder %s748_s27, %s548_s3  ;;  %p550_p3 = pneg %p754_p0 }
  0x18   : > { %s553_s12 = scalar_lea.hbm %s879_s0, 2048  ;;  %p554_p4 = scmp.lt.u32.totalorder %s748_s27, %s879_s0 }
  0x19   : > { %p551_p5 = pnand %p550_p3, %p549_p2  ;;  %p555_p7 = scmp.lt.u32.totalorder %s553_s12, %s548_s3 }
  0x1a   : > { %p557_p13 = scmp.lt.u32.totalorder %s548_s3, %s748_s27 }
  0x1b   : > { %p552_p6 = pneg %p551_p5  ;;  %p556_p10 = por %p555_p7, %p554_p4 }
  0x1d   : > { %p558_p12 = por %p557_p13, %p556_p10 }
  0x1f   : > { %p559_p1 = pnand %p558_p12, %p552_p6 }
  0x21   : > { %562 = shalt.err (!%p559_p1)
}
  0x22   : > { %s563_s16 = scalar_lea.vmem %s750_s29, 1024  ;;  %s662_s17 = smov [#allocation3]  }
  0x23   : > { %p564_p2 = scmp.ne.s32.totalorder %s750_s29, %s563_s16  ;;  %s568_s22 = sshll.u32 %s662_s17, 4  ;;  %s569_s22 = int_to_ptr.vmem [resolvable:$false] %s568_s22 }
  0x24   : > { %s570_s23 = scalar_lea.vmem %s569_s22, 2048  ;;  %p571_p9 = scmp.lt.s32.totalorder %s750_s29, %s569_s22 }
  0x25   : > { %p566_p5 = pnand %p564_p2, %p550_p3  ;;  %p572_p4 = scmp.lt.s32.totalorder %s570_s23, %s563_s16 }
  0x27   : > { %p567_p11 = pneg %p566_p5  ;;  %p573_p7 = por %p572_p4, %p571_p9 }
  0x29   : > { %p574_p10 = pnand %p573_p7, %p567_p11 }
  0x2b   : > { %577 = shalt.err (!%p574_p10)
}
  0x2c   : > { %s663_s24 = smov 256   ;;  %s664_s25 = smov 16  }
  0x2d   : > { %472 = dma.hbm_to_vmem [thread:$0]  (!%p754_p0), %s748_s27, 1024, %s750_s29, %s759_s2, %s663_s24, %s663_s24, %s664_s25  }
  0x2e   : > { %p122_p12 = scmp.lt.s32.totalorder %s660_s11, 3  ;;  %p887_p1 = scmp.ge.s32.totalorder %s660_s11, 1 }
  0x30   : > { %p123_p3 = pnand %p887_p1, %p122_p12 }
  0x31   : > { %s791_s26 = sand.u32 (!%p123_p3), 1, %s644_s7  }
  0x32   : > { %126 = sbr.rel (%p123_p3) target bundleno = 781 (0x30d), region = 24  ;;  %s444_s28 = sshll.u32 (!%p123_p3), %s791_s26, 6 }
  0x33   : > { %s129_s3 = scalar_lea.sflag (!%p123_p3), [#allocation4], %s791_s26  ;;  %s132_s4 = scalar_lea.vmem (!%p123_p3), [#allocation3], %s444_s28 }
  0x39   : > { %631 = dma.done.wait (%p726_p8), %s129_s3, 1024  }
  0x3a   : > { %633 = vsyncadd (%p726_p8), %s129_s3, 4294966272  ;;  %vm156_vm0 = vcmask 261120   ;;  %v665_v0 = vmov 0.0   ;;  %v162_v1 = vld [vmem:[%s132_s4 + $0x8] sm:$0xff]  ;;  %v164_v2 = vld [vmem:[%s132_s4 + $0x18] sm:$0xff]  ;;  %s445_s18 = sshll.u32 %s791_s26, 5 }
  0x3b   : > { %157 = vst.msk [vmem:[#allocation2] sm:$0xff] %vm156_vm0, %v665_v0  ;;  %158 = vst.msk [vmem:[#allocation2 + $0x8] sm:$0xff] %vm156_vm0, %v665_v0  ;;  %v161_v3 = vld [vmem:[%s132_s4] sm:$0xff]  ;;  %v453_v4 = vpack.c.bf16 %v164_v2, %v162_v1  ;;  %v163_v5 = vld [vmem:[%s132_s4 + $0x10] sm:$0xff]  ;;  %237 = vmatprep.mubr.f32.mxu0 %v162_v1  ;;  %s150_s27 = scalar_lea.vmem [#allocation6], %s445_s18  ;;  %s452_s29 = sshll.u32 %s652_s9, 9 }
  0x3c   : > { %159 = vst.msk [vmem:[#allocation2 + $0x10] sm:$0xff] %vm156_vm0, %v665_v0  ;;  %160 = vst.msk [vmem:[#allocation2 + $0x18] sm:$0xff] %vm156_vm0, %v665_v0  ;;  %v166_v6 = vld [vmem:[%s132_s4 + $0x28] sm:$0xff]  ;;  %v168_v7 = vld [vmem:[%s132_s4 + $0x38] sm:$0xff]  ;;  %v455_v8 = vpack.c.bf16 %v163_v5, %v161_v3  ;;  %s352_s30 = sshll.u32 %s150_s27, 4  ;;  %s827_s12 = scalar_lea.hbm %s880_s1, %s452_s29  ;;  %s829_s30 = int_to_ptr.vmem [resolvable:$true] %s352_s30 }
  0x3d   : > { %v457_v9 = vpack.c.bf16 %v168_v7, %v166_v6  ;;  %247 = vmatprep.mubr.f32.mxu1 %v166_v6  ;;  %454 = vmatprep.subr.bf16.mxu0 %v453_v4  ;;  %v165_v10 = vld [vmem:[%s132_s4 + $0x20] sm:$0xff]  ;;  %v167_v11 = vld [vmem:[%s132_s4 + $0x30] sm:$0xff]  ;;  %s339_s9 = scalar_lea.sflag [#allocation5], %s791_s26  ;;  %s578_s13 = scalar_lea.vmem %s829_s30, 512 }
  0x3e   : > { %461 = vmatprep.subr.bf16.mxu1 %v453_v4  ;;  %456 = vmatpush1.bf16.xpose.msra.mxu0 %v455_v8  ;;  %v459_v12 = vpack.c.bf16 %v167_v11, %v165_v10  ;;  %p579_p8 = scmp.ne.s32.totalorder %s829_s30, %s578_s13  ;;  %p888_p9 = scmp.ne.s32.totalorder %s884_s19, 0 }
  0x3f   : > { %463 = vmatpush1.bf16.xpose.msra.mxu1 %v455_v8  ;;  %458 = vmatprep.subr.bf16.mxu0 %v457_v9  ;;  %s666_s15 = smov [#allocation6]  }
  0x40   : > { %462 = vmatprep.subr.bf16.mxu1 %v457_v9  ;;  %p580_p11 = pnand %p579_p8, %p888_p9  ;;  %s582_s16 = sshll.u32 %s666_s15, 4  ;;  %s583_s16 = int_to_ptr.vmem [resolvable:$false] %s582_s16 }
  0x41   : > { %s584_s17 = scalar_lea.vmem %s583_s16, 1024  ;;  %p585_p6 = scmp.lt.s32.totalorder %s829_s30, %s583_s16 }
  0x42   : > { %v169_v13 = vld [vmem:[#allocation2] sm:$0xff]  ;;  %v170_v21 = vld [vmem:[#allocation2 + $0x8] sm:$0xff]  ;;  %p581_p0 = pneg %p580_p11  ;;  %p586_p13 = scmp.lt.s32.totalorder %s584_s17, %s578_s13 }
  0x43   : > { %v171_v14 = vld [vmem:[#allocation2 + $0x10] sm:$0xff]  ;;  %v172_v22 = vld [vmem:[#allocation2 + $0x18] sm:$0xff] }
  0x44   : > { %p587_p2 = por %p586_p13, %p585_p6 }
  0x46   : > { %460 = vmatpush1.bf16.xpose.msra.mxu0 %v459_v12  ;;  %p588_p5 = pnand %p587_p2, %p581_p0 }
  0x47   : > { %464 = vmatpush1.bf16.xpose.msra.mxu1 %v459_v12 }
  0x4d   : > { %238 = vmatmul.mubr.f32.vlgmr.msra.gmra.mrb[0].mxu0 %v161_v3 }
  0x4e   : > { %248 = vmatmul.mubr.f32.vlgmr.msra.gmra.mrb[0].mxu1 %v165_v10  ;;  %242 = vmatprep.mubr.f32.mxu0 %v164_v2 }
  0x4f   : > { %252 = vmatprep.mubr.f32.mxu1 %v168_v7 }
  0x51   : > { %243 = vmatmul.mubr.f32.gmra.mrb[2].mxu0 %v163_v5 }
  0x52   : > { %253 = vmatmul.mubr.f32.gmra.mrb[2].mxu1 %v167_v11 }
 0x120   : > { %v239_v15 = vpop.f32.mrb[0].mxu0 }
 0x121   : > { %v249_v16 = vpop.f32.mrb[0].mxu1  ;;  %v258_v17 = vadd.f32 %v239_v15, %v169_v13  ;;  %v241_v19 = vpop.f32.mrb[1].mxu0 }
 0x122   : > { %v260_v18 = vadd.f32 %v249_v16, %v171_v14  ;;  %v251_v20 = vpop.f32.mrb[1].mxu1 }
 0x123   : > { %263 = vst.msk [vmem:[#allocation2] sm:$0xff] %vm156_vm0, %v258_v17 }
 0x124   : > { %265 = vst.msk [vmem:[#allocation2 + $0x10] sm:$0xff] %vm156_vm0, %v260_v18  ;;  %v244_v23 = vpop.f32.mrb[2].mxu0 }
 0x125   : > { %v254_v24 = vpop.f32.mrb[2].mxu1  ;;  %v259_v25 = vadd.f32 %v244_v23, %v170_v21  ;;  %v246_v27 = vpop.f32.mrb[3].mxu0 }
 0x126   : > { %v261_v26 = vadd.f32 %v254_v24, %v172_v22  ;;  %v256_v28 = vpop.f32.mrb[3].mxu1 }
 0x127   : > { %264 = vst.msk [vmem:[#allocation2 + $0x8] sm:$0xff] %vm156_vm0, %v259_v25 }
 0x128   : > { %266 = vst.msk [vmem:[#allocation2 + $0x18] sm:$0xff] %vm156_vm0, %v261_v26 }
 0x12a   : > { %v270_v30 = vld [vmem:[#allocation2] sm:$0xff] }
 0x12b   : > { %v272_v29 = vld [vmem:[#allocation2 + $0x10] sm:$0xff]  ;;  %v274_v32 = vsel %vm156_vm0, %v270_v30, -inf }
 0x12c   : > { %v280_v31 = vsel %vm156_vm0, %v272_v29, -inf  ;;  %275 = vmax.xlane.f32.xlu0 %v274_v32 }
 0x12d   : > { %281 = vmax.xlane.f32.xlu1 %v280_v31 }
 0x12e   : > { %v271_v34 = vld [vmem:[#allocation2 + $0x8] sm:$0xff] }
 0x12f   : > { %v273_v33 = vld [vmem:[#allocation2 + $0x18] sm:$0xff]  ;;  %v277_v36 = vsel %vm156_vm0, %v271_v34, -inf }
 0x130   : > { %v283_v35 = vsel %vm156_vm0, %v273_v33, -inf  ;;  %278 = vmax.xlane.f32.xlu0 %v277_v36 }
 0x131   : > { %284 = vmax.xlane.f32.xlu1 %v283_v35 }
 0x1b9   : > { %v276_v38 = vpop.xlane.xlu0 %275 }
 0x1ba   : > { %v282_v37 = vpop.xlane.xlu1 %281  ;;  %v286_v39 = vsub.f32 %v276_v38, %v270_v30 }
 0x1bb   : > { %v288_v40 = vsub.f32 %v282_v37, %v272_v29 }
 0x1bc   : > { %v290_v41 = vsel %vm156_vm0, %v286_v39, -inf }
 0x1bd   : > { %291 = vmax.xlane.f32.xlu0 %v290_v41  ;;  %v279_v43 = vpop.xlane.xlu0 %278  ;;  %v296_v46 = vsel %vm156_vm0, %v288_v40, -inf }
 0x1be   : > { %v285_v42 = vpop.xlane.xlu1 %284  ;;  %v287_v44 = vsub.f32 %v279_v43, %v271_v34 }
 0x1bf   : > { %v289_v45 = vsub.f32 %v285_v42, %v273_v33 }
 0x1c0   : > { %v293_v47 = vsel %vm156_vm0, %v287_v44, -inf }
 0x1c1   : > { %297 = vmax.xlane.f32.xlu0 %v296_v46  ;;  %294 = vmax.xlane.f32.xlu1 %v293_v47  ;;  %v299_v48 = vsel %vm156_vm0, %v289_v45, -inf }
 0x1c5   : > { %300 = vmax.xlane.f32.xlu1 %v299_v48 }
 0x24a   : > { %v292_v49 = vpop.xlane.xlu0 %291 }
 0x24b   : > { %v302_v50 = vsub.f32 %v286_v39, %v292_v49 }
 0x24d   : > { %v306_v51 = vmul.f32 1.442695, %v302_v50 }
 0x24e   : > { %v295_v52 = vpop.xlane.xlu1 %294  ;;  %v298_v53 = vpop.xlane.xlu0 %297 }
 0x24f   : > { %532 = vpow2.f32 %v306_v51  ;;  %v303_v54 = vsub.f32 %v287_v44, %v295_v52  ;;  %v304_v55 = vsub.f32 %v288_v40, %v298_v53 }
 0x251   : > { %v308_v56 = vmul.f32 1.442695, %v303_v54  ;;  %v310_v57 = vmul.f32 1.442695, %v304_v55 }
 0x252   : > { %v301_v58 = vpop.xlane.xlu1 %300 }
 0x253   : > { %534 = vpow2.f32 %v308_v56  ;;  %v305_v59 = vsub.f32 %v289_v45, %v301_v58 }
 0x254   : > { %536 = vpow2.f32 %v310_v57 }
 0x255   : > { %v312_v60 = vmul.f32 1.442695, %v305_v59 }
 0x257   : > { %538 = vpow2.f32 %v312_v60 }
 0x259   : > { %v533_v61 = vpop.eup %532 }
 0x25a   : > { %v314_v62 = vsel %vm156_vm0, %v533_v61, 0.0 }
 0x25b   : > { %315 = vadd.xlane.f32.xlu0 %v314_v62 }
 0x25d   : > { %v535_v63 = vpop.eup %534 }
 0x25e   : > { %v537_v0 = vpop.eup %536  ;;  %v317_v1 = vsel %vm156_vm0, %v535_v63, 0.0 }
 0x25f   : > { %318 = vadd.xlane.f32.xlu1 %v317_v1  ;;  %v320_v2 = vsel %vm156_vm0, %v537_v0, 0.0 }
 0x260   : > { %321 = vadd.xlane.f32.xlu0 %v320_v2 }
 0x261   : > { %v539_v3 = vpop.eup %538 }
 0x262   : > { %v323_v4 = vsel %vm156_vm0, %v539_v3, 0.0 }
 0x263   : > { %324 = vadd.xlane.f32.xlu1 %v323_v4 }
 0x2e8   : > { %v316_v5 = vpop.xlane.xlu0 %315 }
 0x2e9   : > { %540 = vrcp.f32 %v316_v5 }
 0x2ec   : > { %v319_v6 = vpop.xlane.xlu1 %318 }
 0x2ed   : > { %542 = vrcp.f32 %v319_v6  ;;  %v322_v7 = vpop.xlane.xlu0 %321 }
 0x2ee   : > { %544 = vrcp.f32 %v322_v7 }
 0x2f0   : > { %v325_v8 = vpop.xlane.xlu1 %324 }
 0x2f1   : > { %546 = vrcp.f32 %v325_v8 }
 0x2f3   : > { %v541_v9 = vpop.eup %540 }
 0x2f4   : > { %v330_v10 = vmul.f32 %v541_v9, %v533_v61 }
 0x2f6   : > { %334 = vst.msk [vmem:[%s150_s27] sm:$0xff] %vm156_vm0, %v330_v10 }
 0x2f7   : > { %v543_v11 = vpop.eup %542 }
 0x2f8   : > { %v545_v12 = vpop.eup %544  ;;  %v331_v13 = vmul.f32 %v543_v11, %v535_v63 }
 0x2f9   : > { %v332_v14 = vmul.f32 %v545_v12, %v537_v0 }
 0x2fa   : > { %335 = vst.msk [vmem:[%s150_s27 + $0x8] sm:$0xff] %vm156_vm0, %v331_v13 }
 0x2fb   : > { %v547_v15 = vpop.eup %546  ;;  %336 = vst.msk [vmem:[%s150_s27 + $0x10] sm:$0xff] %vm156_vm0, %v332_v14 }
 0x2fc   : > { %v333_v16 = vmul.f32 %v547_v15, %v539_v3 }
 0x2fe   : > { %337 = vst.msk [vmem:[%s150_s27 + $0x18] sm:$0xff] %vm156_vm0, %v333_v16 }
 0x2ff   : > { %591 = shalt.err (!%p588_p5)
}
 0x300   : > { %s592_s22 = scalar_lea.hbm %s827_s12, 512  ;;  %s596_s25 = scalar_lea.hbm %s880_s1, 1024 }
 0x301   : > { %p593_p4 = scmp.ne.s32.totalorder %s827_s12, %s592_s22  ;;  %p597_p12 = scmp.lt.u32.totalorder %s827_s12, %s880_s1 }
 0x302   : > { %p598_p1 = scmp.lt.u32.totalorder %s596_s25, %s592_s22  ;;  %p600_p8 = scmp.lt.u32.totalorder %s592_s22, %s827_s12 }
 0x303   : > { %p594_p7 = pnand %p593_p4, %p888_p9 }
 0x304   : > { %p599_p3 = por %p598_p1, %p597_p12 }
 0x305   : > { %p595_p10 = pneg %p594_p7 }
 0x306   : > { %p601_p11 = por %p600_p8, %p599_p3 }
 0x308   : > { %p602_p0 = pnand %p601_p11, %p595_p10 }
 0x30a   : > { %605 = shalt.err (!%p602_p0)
}
 0x30b   : > { %s667_s4 = smov 128   ;;  %s668_s18 = smov 8  }
 0x30c   : > { %467 = dma.vmem_to_hbm [thread:$0]  (%p888_p9), %s829_s30, 512, %s827_s12, %s339_s9, %s667_s4, %s667_s4, %s668_s18  }
 0x30d PF: > { %s367_s27 = sand.u32 1, %s640_s6   ;;  %p889_p6 = scmp.ne.s32.totalorder %s885_s21, 0 }
 0x30e   : > { %p890_p13 = scmp.ge.s32.totalorder %s660_s11, 2  ;;  %s368_s29 = scalar_lea.sflag [#allocation5], %s367_s27 }
 0x310   : > { %p474_p2 = pnand %p890_p13, %p889_p6 }
 0x312   : > { %635 = dma.done.wait (!%p474_p2), %s368_s29, 512  }
 0x313   : > { %637 = vsyncadd (!%p474_p2), %s368_s29, 4294966784  ;;  %s17_s11 = sadd.s32 1, %s660_s11   ;;  %s891_s6 = smov %s644_s7 }
 0x314   : > { %p14_p5 = scmp.ge.s32.totalorder %s17_s11, 4   ;;  %s892_s7 = smov %s648_s8 }
 0x315   : > { %s893_s8 = smov %s735_s20  ;;  %s894_s9 = smov %s656_s10 }
 0x316   : > { %s895_s10 = smov %s897_s14  ;;  %16 = sbr.rel (!%p14_p5) target bundleno = 6 (0x6), region = 77 }
 0x31d   :  { %373 = vsyncpa [#allocation4], 1 }
 0x31e   :  { %375 = vsyncpa [#allocation4 + $0x1], 1 }
 0x31f   :  { %376 = vsyncpa [#allocation5], 1 }
 0x320   :  { %378 = vsyncpa [#allocation5 + $0x1], 1 }

</bundles_post_ra>
